<compile_context>
chip_gen: v5e
topology: v5e:2x2
jax: 0.10.0
libtpu: 0.0.40
codegen_flags: <defaults>
</compile_context>

<pallas_src>
import functools

import jax
import jax.numpy as jnp
from jax.experimental import pallas as pl
from jax.experimental.pallas import tpu as pltpu

SUBLANE = 8     # TPU sublane width (second-to-last-dim alignment)
H1 = 256        # fc1 out-features
H2 = 128        # fc2 out-features


def _round_up(n, m):
    return ((n + m - 1) // m) * m


def _make_kernel(bf16_act):
    """Build the fused MLP kernel; `bf16_act` chooses the sigmoid precision."""

    def _mlp_kernel(x_ref, w1_ref, b1_ref, w2_ref, b2_ref, w3_ref, b3_ref, o_ref):
        # fc1 + sigmoid : [tb, input_dims]bf16 @ [input_dims, 256]bf16 -> f32
        x = x_ref[...].astype(jnp.bfloat16)            # cast in-kernel; HBM keeps raw f32
        h1 = jnp.dot(x, w1_ref[...],
                     preferred_element_type=jnp.float32) + b1_ref[...]
        if bf16_act:
            h1 = jax.nn.sigmoid(h1.astype(jnp.bfloat16))      # bf16 EUP (v6e/v7x)
        else:
            h1 = jax.nn.sigmoid(h1).astype(jnp.bfloat16)      # f32 EUP (v5e and older)

        # fc2 + sigmoid : [tb, 256]bf16 @ [256, 128]bf16 -> f32
        h2 = jnp.dot(h1, w2_ref[...],
                     preferred_element_type=jnp.float32) + b2_ref[...]
        if bf16_act:
            h2 = jax.nn.sigmoid(h2.astype(jnp.bfloat16))
        else:
            h2 = jax.nn.sigmoid(h2).astype(jnp.bfloat16)

        # fc3 (no activation) : [tb, 128]bf16 @ [128, num_classes]bf16 -> f32
        # Narrow (num_classes-wide) store; a few masked vst's but ~12x fewer HBM bytes.
        o_ref[...] = jnp.dot(h2, w3_ref[...],
                             preferred_element_type=jnp.float32) + b3_ref[...]

    return _mlp_kernel


def prepare_params(w1, b1, w2, b2, w3, b3):
    """Cast weights to bf16 (MXU inputs) and reshape biases to rows. No padding."""
    return (w1.astype(jnp.bfloat16), b1.reshape(1, -1).astype(jnp.float32),
            w2.astype(jnp.bfloat16), b2.reshape(1, -1).astype(jnp.float32),
            w3.astype(jnp.bfloat16), b3.reshape(1, -1).astype(jnp.float32))


def _pick_batch_tile(batch):
    if batch <= 256:
        return _round_up(batch, SUBLANE)
    # Large tiles amortize the ~0.35us/grid-step overhead; cap so the grid keeps
    # >= 2 steps (v7x two-TensorCore batch split) and the double-buffered working
    # set stays well inside the default scoped-VMEM limits on every generation.
    half = _round_up(-(-batch // 2), 256)
    return max(256, min(2048, half))


def _bf16_activation_ok():
    """bf16 EUP/VPU exists on v6e/v7x; keep the f32 sigmoid path elsewhere."""
    try:
        kind = jax.devices()[0].device_kind.lower()
    except Exception:
        return False
    return any(tag in kind for tag in ("v6", "v7", "7x"))


@functools.partial(jax.jit, static_argnames=("bf16_act",))
def mlp_forward(x, params, *, bf16_act=False):
    """x: [B, input_dims] f32; params: output of prepare_params."""
    w1p, b1p, w2p, b2p, w3p, b3p = params
    B, input_dims = x.shape
    num_classes = w3p.shape[1]

    tb = _pick_batch_tile(B)
    grid = (-(-B // tb),)                       # ceil(B / tb); no batch padding

    flops = 2 * B * (input_dims * H1 + H1 * H2 + H2 * num_classes)
    transcendentals = B * (H1 + H2)
    bytes_accessed = (
        x.size * 4                                                   # raw f32 input
        + (w1p.size + w2p.size + w3p.size) * 2                       # bf16 weights
        + (b1p.size + b2p.size + b3p.size) * 4                       # f32 biases
        + B * num_classes * 4)                                       # narrow f32 output

    return pl.pallas_call(
        _make_kernel(bf16_act),
        out_shape=jax.ShapeDtypeStruct((B, num_classes), jnp.float32),
        grid=grid,
        in_specs=[
            pl.BlockSpec((tb, input_dims), lambda i: (i, 0)),   # x: raw f32, tiled over batch
            pl.BlockSpec((input_dims, H1), lambda i: (0, 0)),   # w1: VMEM-resident
            pl.BlockSpec((1, H1), lambda i: (0, 0)),            # b1
            pl.BlockSpec((H1, H2), lambda i: (0, 0)),           # w2
            pl.BlockSpec((1, H2), lambda i: (0, 0)),            # b2
            pl.BlockSpec((H2, num_classes), lambda i: (0, 0)),  # w3 (narrow, unpadded)
            pl.BlockSpec((1, num_classes), lambda i: (0, 0)),   # b3
        ],
        out_specs=pl.BlockSpec((tb, num_classes), lambda i: (i, 0)),
        compiler_params=pltpu.CompilerParams(
            dimension_semantics=("parallel",)),                 # megacore batch split
        cost_estimate=pl.CostEstimate(
            flops=flops,
            transcendentals=transcendentals,
            bytes_accessed=bytes_accessed),
    )(x, w1p, b1p, w2p, b2p, w3p, b3p)


def _init_linear(key, fan_in, fan_out):
    # Deterministic init mimicking nn.Linear's uniform(-1/sqrt(fan_in), 1/sqrt(fan_in)).
    kw, kb = jax.random.split(key)
    bound = 1.0 / jnp.sqrt(jnp.float32(fan_in))
    # Stored already transposed: [in, out]
    w_t = jax.random.uniform(kw, (fan_in, fan_out), jnp.float32, -bound, bound)
    b = jax.random.uniform(kb, (fan_out,), jnp.float32, -bound, bound)
    return w_t, b


def _reference(x, params, bf16_act):
    # Same math as the kernel (bf16 weights/activations, f32 accumulation) in plain JAX.
    w1p, b1p, w2p, b2p, w3p, b3p = params

    def act(h):
        return (jax.nn.sigmoid(h.astype(jnp.bfloat16)) if bf16_act
                else jax.nn.sigmoid(h).astype(jnp.bfloat16))

    h1 = act(jnp.dot(x.astype(jnp.bfloat16), w1p,
                     preferred_element_type=jnp.float32) + b1p)
    h2 = act(jnp.dot(h1, w2p, preferred_element_type=jnp.float32) + b2p)
    return jnp.dot(h2, w3p, preferred_element_type=jnp.float32) + b3p


if __name__ == "__main__":
    key = jax.random.PRNGKey(0)
    k_x, k_x2, k1, k2, k3 = jax.random.split(key, 5)

    input_dims = 32
    num_classes = 10

    w1, b1 = _init_linear(k1, input_dims, H1)
    w2, b2 = _init_linear(k2, H1, H2)
    w3, b3 = _init_linear(k3, H2, num_classes)
    params = prepare_params(w1, b1, w2, b2, w3, b3)

    bf16_act = _bf16_activation_ok()

    # Small batch (single grid step).
    batch = 8
    x = jax.random.normal(k_x, (batch, input_dims), jnp.float32)
    out = jax.block_until_ready(mlp_forward(x, params, bf16_act=bf16_act))
    ref = _reference(x, params, bf16_act)
    assert out.shape == (batch, num_classes)
    assert jnp.allclose(out, ref, atol=5e-3, rtol=5e-3), float(jnp.max(jnp.abs(out - ref)))

    # Larger batch exercising the multi-step grid with a partial final block.
    batch2 = 600
    x2 = jax.random.normal(k_x2, (batch2, input_dims), jnp.float32)
    out2 = jax.block_until_ready(mlp_forward(x2, params, bf16_act=bf16_act))
    ref2 = _reference(x2, params, bf16_act)
    assert out2.shape == (batch2, num_classes)
    assert jnp.allclose(out2, ref2, atol=5e-3, rtol=5e-3), float(jnp.max(jnp.abs(out2 - ref2)))

    # TODO(synk): optimizer (Adam) / CrossEntropyLoss / learn() are training-side
    # and are not part of the forward pass, so they are not implemented here.
    print("KERNEL_OK")
</pallas_src>

<mosaic_0001>
module attributes {stable_mosaic.version = 11 : i64} {
  func.func @_mlp_kernel(%arg0: i32, %arg1: memref<8x32xf32, #tpu.memory_space<vmem>>, %arg2: memref<32x256xbf16, #tpu.memory_space<vmem>>, %arg3: memref<1x256xf32, #tpu.memory_space<vmem>>, %arg4: memref<256x128xbf16, #tpu.memory_space<vmem>>, %arg5: memref<1x128xf32, #tpu.memory_space<vmem>>, %arg6: memref<128x10xbf16, #tpu.memory_space<vmem>>, %arg7: memref<1x10xf32, #tpu.memory_space<vmem>>, %arg8: memref<8x10xf32, #tpu.memory_space<vmem>>) attributes {dimension_semantics = [#tpu.dimension_semantics<parallel>], iteration_bounds = array<i64: 1>, scalar_prefetch = 0 : i64, scratch_operands = 0 : i64, tpu.core_type = #tpu.core_type<tc>, window_params = [{transform_indices = @transform_0, window_bounds = array<i64: 8, 32>}, {pipeline_mode = #tpu.pipeline_mode<synchronous>, transform_indices = @transform_1, window_bounds = array<i64: 32, 256>}, {pipeline_mode = #tpu.pipeline_mode<synchronous>, transform_indices = @transform_2, window_bounds = array<i64: 1, 256>}, {pipeline_mode = #tpu.pipeline_mode<synchronous>, transform_indices = @transform_3, window_bounds = array<i64: 256, 128>}, {pipeline_mode = #tpu.pipeline_mode<synchronous>, transform_indices = @transform_4, window_bounds = array<i64: 1, 128>}, {pipeline_mode = #tpu.pipeline_mode<synchronous>, transform_indices = @transform_5, window_bounds = array<i64: 128, 10>}, {pipeline_mode = #tpu.pipeline_mode<synchronous>, transform_indices = @transform_6, window_bounds = array<i64: 1, 10>}, {transform_indices = @transform_7, window_bounds = array<i64: 8, 10>}]} {
    %c0 = arith.constant 0 : index
    %c0_0 = arith.constant 0 : index
    %0 = vector.load %arg1[%c0, %c0_0] : memref<8x32xf32, #tpu.memory_space<vmem>>, vector<8x32xf32>
    %1 = arith.truncf %0 : vector<8x32xf32> to vector<8x32xbf16>
    %c0_1 = arith.constant 0 : index
    %c0_2 = arith.constant 0 : index
    %2 = vector.load %arg2[%c0_1, %c0_2] : memref<32x256xbf16, #tpu.memory_space<vmem>>, vector<32x256xbf16>
    %cst = arith.constant dense<0.000000e+00> : vector<8x256xf32>
    %3 = tpu.matmul %1, %2, %cst {dimension_numbers = #tpu.dot_dimension_numbers<[1], [0], [0], [1], [0, 0, 1, 1], [], []>} : vector<8x32xbf16>, vector<32x256xbf16>, vector<8x256xf32> -> vector<8x256xf32>
    %c0_3 = arith.constant 0 : index
    %c0_4 = arith.constant 0 : index
    %4 = vector.load %arg3[%c0_3, %c0_4] : memref<1x256xf32, #tpu.memory_space<vmem>>, vector<1x256xf32>
    %5 = vector.broadcast %4 : vector<1x256xf32> to vector<8x256xf32>
    %6 = arith.addf %3, %5 : vector<8x256xf32>
    %7 = arith.negf %6 : vector<8x256xf32>
    %8 = math.exp %7 : vector<8x256xf32>
    %cst_5 = arith.constant 1.000000e+00 : f32
    %9 = vector.broadcast %cst_5 : f32 to vector<8x256xf32>
    %10 = arith.addf %9, %8 : vector<8x256xf32>
    %11 = arith.divf %9, %10 : vector<8x256xf32>
    %12 = arith.truncf %11 : vector<8x256xf32> to vector<8x256xbf16>
    %c0_6 = arith.constant 0 : index
    %c0_7 = arith.constant 0 : index
    %13 = vector.load %arg4[%c0_6, %c0_7] : memref<256x128xbf16, #tpu.memory_space<vmem>>, vector<256x128xbf16>
    %cst_8 = arith.constant dense<0.000000e+00> : vector<8x128xf32>
    %14 = tpu.matmul %12, %13, %cst_8 {dimension_numbers = #tpu.dot_dimension_numbers<[1], [0], [0], [1], [0, 0, 1, 1], [], []>} : vector<8x256xbf16>, vector<256x128xbf16>, vector<8x128xf32> -> vector<8x128xf32>
    %c0_9 = arith.constant 0 : index
    %c0_10 = arith.constant 0 : index
    %15 = vector.load %arg5[%c0_9, %c0_10] : memref<1x128xf32, #tpu.memory_space<vmem>>, vector<1x128xf32>
    %16 = vector.broadcast %15 : vector<1x128xf32> to vector<8x128xf32>
    %17 = arith.addf %14, %16 : vector<8x128xf32>
    %18 = arith.negf %17 : vector<8x128xf32>
    %19 = math.exp %18 : vector<8x128xf32>
    %cst_11 = arith.constant 1.000000e+00 : f32
    %20 = vector.broadcast %cst_11 : f32 to vector<8x128xf32>
    %21 = arith.addf %20, %19 : vector<8x128xf32>
    %22 = arith.divf %20, %21 : vector<8x128xf32>
    %23 = arith.truncf %22 : vector<8x128xf32> to vector<8x128xbf16>
    %c0_12 = arith.constant 0 : index
    %c0_13 = arith.constant 0 : index
    %24 = vector.load %arg6[%c0_12, %c0_13] : memref<128x10xbf16, #tpu.memory_space<vmem>>, vector<128x10xbf16>
    %cst_14 = arith.constant dense<0.000000e+00> : vector<8x10xf32>
    %25 = tpu.matmul %23, %24, %cst_14 {dimension_numbers = #tpu.dot_dimension_numbers<[1], [0], [0], [1], [0, 0, 1, 1], [], []>} : vector<8x128xbf16>, vector<128x10xbf16>, vector<8x10xf32> -> vector<8x10xf32>
    %c0_15 = arith.constant 0 : index
    %c0_16 = arith.constant 0 : index
    %26 = vector.load %arg7[%c0_15, %c0_16] : memref<1x10xf32, #tpu.memory_space<vmem>>, vector<1x10xf32>
    %27 = vector.broadcast %26 : vector<1x10xf32> to vector<8x10xf32>
    %28 = arith.addf %25, %27 : vector<8x10xf32>
    %c0_17 = arith.constant 0 : index
    %c0_18 = arith.constant 0 : index
    %29 = vector.load %arg8[%c0_17, %c0_18] : memref<8x10xf32, #tpu.memory_space<vmem>>, vector<8x10xf32>
    tpu.vector_store %arg8[%c0_17, %c0_18], %28 {strides = array<i32>} : memref<8x10xf32, #tpu.memory_space<vmem>>, vector<8x10xf32>,
    return
  }
  func.func @transform_0(%arg0: i32) -> (i32, i32) {
    %c0_i32 = arith.constant 0 : i32
    %c0_i32_0 = arith.constant 0 : i32
    return %arg0, %c0_i32 : i32, i32
  }
  func.func @transform_1(%arg0: i32) -> (i32, i32) {
    %c0_i32 = arith.constant 0 : i32
    %c0_i32_0 = arith.constant 0 : i32
    %c0_i32_1 = arith.constant 0 : i32
    return %c0_i32, %c0_i32_0 : i32, i32
  }
  func.func @transform_2(%arg0: i32) -> (i32, i32) {
    %c0_i32 = arith.constant 0 : i32
    %c0_i32_0 = arith.constant 0 : i32
    %c0_i32_1 = arith.constant 0 : i32
    return %c0_i32, %c0_i32_0 : i32, i32
  }
  func.func @transform_3(%arg0: i32) -> (i32, i32) {
    %c0_i32 = arith.constant 0 : i32
    %c0_i32_0 = arith.constant 0 : i32
    %c0_i32_1 = arith.constant 0 : i32
    return %c0_i32, %c0_i32_0 : i32, i32
  }
  func.func @transform_4(%arg0: i32) -> (i32, i32) {
    %c0_i32 = arith.constant 0 : i32
    %c0_i32_0 = arith.constant 0 : i32
    %c0_i32_1 = arith.constant 0 : i32
    return %c0_i32, %c0_i32_0 : i32, i32
  }
  func.func @transform_5(%arg0: i32) -> (i32, i32) {
    %c0_i32 = arith.constant 0 : i32
    %c0_i32_0 = arith.constant 0 : i32
    %c0_i32_1 = arith.constant 0 : i32
    return %c0_i32, %c0_i32_0 : i32, i32
  }
  func.func @transform_6(%arg0: i32) -> (i32, i32) {
    %c0_i32 = arith.constant 0 : i32
    %c0_i32_0 = arith.constant 0 : i32
    %c0_i32_1 = arith.constant 0 : i32
    return %c0_i32, %c0_i32_0 : i32, i32
  }
  func.func @transform_7(%arg0: i32) -> (i32, i32) {
    %c0_i32 = arith.constant 0 : i32
    %c0_i32_0 = arith.constant 0 : i32
    return %arg0, %c0_i32 : i32, i32
  }
}

</mosaic_0001>

<bundles_post_ra>
// kernel: mlp_forward.1
= control target key start
LH: loop header
LB: loop body
LE: loop exit
PB: predicated region body
PF: predicated region fallthrough
CT: control target
= control target key end

     0   :  { %12 = vsyncpa [#allocation3], 0  ;;  %s749_s0 = inlined_call_operand.vmem [shape: f32[8,32], index: 0, kind: input, shape index: {}]   ;;  %s750_s1 = inlined_call_operand.vmem [shape: bf16[32,256], index: 1, kind: input, shape index: {}]   ;;  %s751_s2 = inlined_call_operand.vmem [shape: f32[1,256], index: 2, kind: input, shape index: {}]   ;;  %s752_s3 = inlined_call_operand.hbm [shape: bf16[256,128], index: 3, kind: input, shape index: {}]   ;;  %s753_s4 = inlined_call_operand.vmem [shape: f32[1,128], index: 4, kind: input, shape index: {}]   ;;  %s754_s5 = inlined_call_operand.vmem [shape: bf16[128,10], index: 5, kind: input, shape index: {}]   ;;  %s755_s6 = inlined_call_operand.vmem [shape: f32[1,10], index: 6, kind: input, shape index: {}]   ;;  %s756_s7 = inlined_call_operand.hbm [shape: f32[8,10], index: 7, kind: output, shape index: {}]  }
   0x1   :  { %13 = vsyncpa [#allocation4], 0  ;;  %s24_s26 = sshll.u32 %s752_s3, 4  ;;  %s639_s27 = smov [#allocation2]   ;;  %s25_s26 = int_to_ptr.hbm [resolvable:$true] %s24_s26 }
   0x2   :  { %s26_s28 = sshll.u32 %s639_s27, 4  ;;  %s640_s29 = smov 64   ;;  %s27_s28 = int_to_ptr.vmem [resolvable:$true] %s26_s28 }
   0x3   :  { %s641_s30 = smov 4  }
   0x4   :  { %32 = dma.hbm_to_vmem [thread:$0]  %s25_s26, 2048, %s27_s28, [#allocation3], %s640_s29, %s640_s29, %s641_s30  }
   0x5   :  { %635 = dma.done.wait [#allocation3], 2048  }
   0x6   :  { %636 = vsyncadd [#allocation3], 4294965248  ;;  %v434_v0 = vld [vmem:[%s750_s1 + $0x10] sm:$0xf]  ;;  %v544_v1 = vld [vmem:[%s750_s1 + $0x14] sm:$0xf0] }
   0x7   :  { %v426_v2 = vld [vmem:[%s750_s1] sm:$0xf]  ;;  %v435_v3 = vor.u32 %v544_v1, %v434_v0  ;;  %v542_v4 = vld [vmem:[%s750_s1 + $0x4] sm:$0xf0]  ;;  %v543_v5 = vld [vmem:[%s750_s1 + $0x14] sm:$0xf] }
   0x8   :  { %v436_v6 = vld [vmem:[%s750_s1 + $0x18] sm:$0xf0]  ;;  %v427_v7 = vor.u32 %v542_v4, %v426_v2  ;;  %v44_v8 = vld [vmem:[%s749_s0] sm:$0xff]  ;;  %v428_v11 = vld [vmem:[%s750_s1 + $0x8] sm:$0xf0]  ;;  %vm76_vm0 = vcmask 261120  }
   0x9   :  { %86 = vmatpush.bf16.msra.mxu1 %v435_v3  ;;  %v439_v9 = vor.u32 %v543_v5, %v436_v6  ;;  %v541_v10 = vld [vmem:[%s750_s1 + $0x4] sm:$0xf]  ;;  %v45_v12 = vpack.c.bf16 %v44_v8, %v44_v8  ;;  %v552_v14 = vld [vmem:[#allocation2 + $0x38] sm:$0xff]  ;;  %v551_v15 = vld [vmem:[#allocation2 + $0x30] sm:$0xff]  ;;  %s642_s18 = smov [#allocation5]   ;;  %s414_s22 = sshll.u32 %s756_s7, 4  ;;  %s415_s22 = int_to_ptr.hbm [resolvable:$true] %s414_s22 }
   0xa   :  { %v431_v13 = vor.u32 %v541_v10, %v428_v11  ;;  %278 = vmatpush.bf16.msra.mxu2 %v552_v14  ;;  %v550_v16 = vld [vmem:[#allocation2 + $0x28] sm:$0xff]  ;;  %v549_v17 = vld [vmem:[#allocation2 + $0x20] sm:$0xff]  ;;  %v548_v18 = vld [vmem:[#allocation2 + $0x18] sm:$0xff]  ;;  %s412_s19 = sshll.u32 %s642_s18, 4  ;;  %vm405_vm13 = vcmask 80896   ;;  %s413_s19 = int_to_ptr.vmem [resolvable:$true] %s412_s19 }
   0xb   :  { %v560_v19 = vld [vmem:[#allocation2 + $0x78] sm:$0xff]  ;;  %v547_v20 = vld [vmem:[#allocation2 + $0x10] sm:$0xff]  ;;  %v546_v22 = vld [vmem:[#allocation2 + $0x8] sm:$0xff] }
   0xc   :  { %291 = vmatpush.bf16.msra.mxu3 %v560_v19  ;;  %v559_v21 = vld [vmem:[#allocation2 + $0x70] sm:$0xff]  ;;  %v558_v23 = vld [vmem:[#allocation2 + $0x68] sm:$0xff]  ;;  %v50_v24 = vld [vmem:[%s751_s2] sm:$0x3] }
   0xd   :  { %87 = vmatpush.bf16.msra.mxu1 %v427_v7  ;;  %v545_v25 = vld [vmem:[#allocation2] sm:$0xff]  ;;  %v52_v27 = vperm.slane %v50_v24, 0  ;;  %v556_v29 = vld [vmem:[#allocation2 + $0x58] sm:$0xff]  ;;  %v555_v31 = vld [vmem:[#allocation2 + $0x50] sm:$0xff]  ;;  %v53_v38 = vperm.slane %v50_v24, 1 }
   0xe   :  { %279 = vmatpush.bf16.msra.mxu2 %v551_v15  ;;  %v557_v26 = vld [vmem:[#allocation2 + $0x60] sm:$0xff]  ;;  %v554_v33 = vld [vmem:[#allocation2 + $0x48] sm:$0xff]  ;;  %v568_v3 = vld [vmem:[%s754_s5 + $0x38] sm:$0xff] }
   0xf   :  { %v553_v35 = vld [vmem:[#allocation2 + $0x40] sm:$0xff]  ;;  %392 = vmatpush.bf16.msra.mxu0 %v568_v3  ;;  %v567_v4 = vld [vmem:[%s754_s5 + $0x30] sm:$0xff]  ;;  %v566_v5 = vld [vmem:[%s754_s5 + $0x28] sm:$0xff] }
  0x10   :  { %440 = vmatmul.msk.bf16.vlgmr.msra.gmra.mxu1 %vm76_vm0, %v45_v12  ;;  %292 = vmatpush.bf16.msra.mxu3 %v559_v21  ;;  %v565_v6 = vld [vmem:[%s754_s5 + $0x20] sm:$0xff]  ;;  %v564_v7 = vld [vmem:[%s754_s5 + $0x18] sm:$0xff]  ;;  %v562_v10 = vld [vmem:[%s754_s5 + $0x8] sm:$0xff] }
  0x11   :  { %99 = vmatpush.bf16.msrb.mxu1 %v439_v9  ;;  %v563_v9 = vld [vmem:[%s754_s5 + $0x10] sm:$0xff] }
  0x12   :  { %280 = vmatpush.bf16.msra.mxu2 %v550_v16 }
  0x13   :  { %393 = vmatpush.bf16.msra.mxu0 %v567_v4 }
  0x14   :  { %293 = vmatpush.bf16.msra.mxu3 %v558_v23 }
  0x15   :  { %100 = vmatpush.bf16.msrb.mxu1 %v431_v13  ;;  %v561_v13 = vld [vmem:[%s754_s5] sm:$0xff] }
  0x16   :  { %281 = vmatpush.bf16.msra.mxu2 %v549_v17 }
  0x17   :  { %394 = vmatpush.bf16.msra.mxu0 %v566_v5 }
  0x18   :  { %294 = vmatpush.bf16.msra.mxu3 %v557_v26 }
  0x1a   :  { %282 = vmatpush.bf16.msra.mxu2 %v548_v18 }
  0x1b   :  { %395 = vmatpush.bf16.msra.mxu0 %v565_v6 }
  0x1c   :  { %295 = vmatpush.bf16.msra.mxu3 %v556_v29 }
  0x1e   :  { %283 = vmatpush.bf16.msra.mxu2 %v547_v20 }
  0x1f   :  { %396 = vmatpush.bf16.msra.mxu0 %v564_v7 }
  0x20   :  { %441 = vmatmul.msk.bf16.vlgmr.msrb.gmra.mxu1 %vm76_vm0, %v45_v12  ;;  %296 = vmatpush.bf16.msra.mxu3 %v555_v31  ;;  %v573_v12 = vld [vmem:[%s753_s4] ss:$0 sm:$0xff] }
  0x22   :  { %284 = vmatpush.bf16.msra.mxu2 %v546_v22 }
  0x23   :  { %397 = vmatpush.bf16.msra.mxu0 %v563_v9 }
  0x24   :  { %297 = vmatpush.bf16.msra.mxu3 %v554_v33 }
  0x26   :  { %285 = vmatpush.bf16.msra.mxu2 %v545_v25 }
  0x27   :  { %398 = vmatpush.bf16.msra.mxu0 %v562_v10 }
  0x28   :  { %298 = vmatpush.bf16.msra.mxu3 %v553_v35 }
  0x2b   :  { %399 = vmatpush.bf16.msra.mxu0 %v561_v13 }
  0x8d   :  { %v89_v28 = vpop.f32.mrf.mxu1 }
  0x8e   :  { %v90_v30 = vadd.f32 %v89_v28, %v52_v27 }
  0x90   :  { %v442_v32 = vmul.f32 -1.442695, %v90_v30 }
  0x92   :  { %575 = vpow2.f32 %v442_v32  ;;  %v574_v32 = vld [vmem:[%s755_s6] ss:$0 sm:$0xff] }
  0x95   :  { %v91_v34 = vpop.f32.mrf.mxu1 }
  0x98   :  { %v576_v36 = vpop.eup %575 }
  0x99   :  { %v112_v37 = vadd.f32 1.0, %v576_v36 }
  0x9b   :  { %577 = vrcp.f32 %v112_v37  ;;  %v125_v46 = vand.u32 2147483648, %v112_v37  ;;  %v123_v48 = vand.u32 2147483647, %v112_v37  ;;  %vm119_vm2 = vweird.f32 %v112_v37 }
  0x9d   :  { %v102_v39 = vpop.f32.mrf.mxu1  ;;  %v126_v52 = vor.u32 1.1754944e-38, %v125_v46  ;;  %vm124_vm4 = vcmp.eq.f32.partialorder %v123_v48, 8.507059e+37 }
  0x9e   :  { %v103_v40 = vadd.f32 %v102_v39, %v53_v38 }
  0xa0   :  { %v443_v41 = vmul.f32 -1.442695, %v103_v40 }
  0xa1   :  { %v578_v42 = vpop.eup %577 }
  0xa2   :  { %579 = vpow2.f32 %v443_v41  ;;  %v115_v43 = vmul.f32 %v578_v42, %v112_v37  ;;  %vm120_vm1 = vweird.f32 %v578_v42 }
  0xa3   :  { %vm121_vm3 = vmor %vm119_vm2, %vm120_vm1 }
  0xa4   :  { %v116_v44 = vsub.f32 1.0, %v115_v43 }
  0xa5   :  { %v104_v45 = vpop.f32.mrf.mxu1 }
  0xa6   :  { %v117_v47 = vmul.f32 %v578_v42, %v116_v44 }
  0xa8   :  { %v580_v49 = vpop.eup %579  ;;  %v118_v50 = vadd.f32 %v578_v42, %v117_v47 }
  0xa9   :  { %v113_v51 = vadd.f32 1.0, %v580_v49 }
  0xaa   :  { %v122_v53 = vsel %vm121_vm3, %v578_v42, %v118_v50 }
  0xab   :  { %581 = vrcp.f32 %v113_v51  ;;  %v127_v54 = vsel %vm124_vm4, %v126_v52, %v122_v53  ;;  %v140_v59 = vand.u32 2147483648, %v113_v51  ;;  %v138_v61 = vand.u32 2147483647, %v113_v51 }
  0xac   :  { %v144_v55 = vpack.c.bf16 %v127_v54, %v127_v54  ;;  %vm134_vm6 = vweird.f32 %v113_v51 }
  0xad   :  { %v141_v63 = vor.u32 1.1754944e-38, %v140_v59  ;;  %vm139_vm8 = vcmp.eq.f32.partialorder %v138_v61, 8.507059e+37 }
  0xae   :  { %286 = vmatmul.bf16.vlgmr.msra.gmra.mxu2 %v144_v55 }
  0xb1   :  { %v582_v56 = vpop.eup %581 }
  0xb2   :  { %v130_v57 = vmul.f32 %v582_v56, %v113_v51  ;;  %vm135_vm5 = vweird.f32 %v582_v56 }
  0xb3   :  { %vm136_vm7 = vmor %vm134_vm6, %vm135_vm5 }
  0xb4   :  { %v131_v58 = vsub.f32 1.0, %v130_v57 }
  0xb6   :  { %v132_v60 = vmul.f32 %v582_v56, %v131_v58 }
  0xb8   :  { %v133_v62 = vadd.f32 %v582_v56, %v132_v60 }
  0xba   :  { %v137_v0 = vsel %vm136_vm7, %v582_v56, %v133_v62 }
  0xbb   :  { %v142_v1 = vsel %vm139_vm8, %v141_v63, %v137_v0 }
  0xbc   :  { %v145_v2 = vpack.c.bf16 %v142_v1, %v142_v1 }
  0xbe   :  { %299 = vmatmul.bf16.vlgmr.msra.gmra.mxu3 %v145_v2 }
 0x131   :  { %v287_v8 = vpop.f32.mrf.mxu2 }
 0x132   :  { %v288_v14 = vadd.f32 %v573_v12, %v287_v8 }
 0x139   :  { %v289_v11 = vpop.f32.mrf.mxu2 }
 0x141   :  { %v300_v15 = vpop.f32.mrf.mxu3 }
 0x142   :  { %v301_v16 = vadd.f32 %v300_v15, %v288_v14 }
 0x144   :  { %v508_v17 = vmul.f32 -1.442695, %v301_v16 }
 0x146   :  { %583 = vpow2.f32 %v508_v17 }
 0x149   :  { %v302_v18 = vpop.f32.mrf.mxu3 }
 0x14c   :  { %v584_v19 = vpop.eup %583 }
 0x14d   :  { %v307_v20 = vadd.f32 1.0, %v584_v19 }
 0x14f   :  { %585 = vrcp.f32 %v307_v20  ;;  %v319_v24 = vand.u32 2147483648, %v307_v20  ;;  %v317_v26 = vand.u32 2147483647, %v307_v20  ;;  %vm313_vm10 = vweird.f32 %v307_v20 }
 0x151   :  { %v320_v28 = vor.u32 1.1754944e-38, %v319_v24  ;;  %vm318_vm12 = vcmp.eq.f32.partialorder %v317_v26, 8.507059e+37 }
 0x155   :  { %v586_v21 = vpop.eup %585 }
 0x156   :  { %v309_v22 = vmul.f32 %v586_v21, %v307_v20  ;;  %vm314_vm9 = vweird.f32 %v586_v21 }
 0x157   :  { %vm315_vm11 = vmor %vm313_vm10, %vm314_vm9 }
 0x158   :  { %v310_v23 = vsub.f32 1.0, %v309_v22 }
 0x15a   :  { %v311_v25 = vmul.f32 %v586_v21, %v310_v23 }
 0x15c   :  { %v312_v27 = vadd.f32 %v586_v21, %v311_v25 }
 0x15e   :  { %v316_v29 = vsel %vm315_vm11, %v586_v21, %v312_v27 }
 0x15f   :  { %v321_v30 = vsel %vm318_vm12, %v320_v28, %v316_v29 }
 0x160   :  { %v323_v31 = vpack.c.bf16 %v321_v30, %v321_v30 }
 0x162   :  { %400 = vmatmul.bf16.vlgmr.msra.gmra.mxu0 %v323_v31 }
 0x1df   :  { %v401_v33 = vpop.f32.mrf.mxu0 }
 0x1e0   :  { %v402_v34 = vadd.f32 %v574_v32, %v401_v33 }
 0x1e2   :  { %406 = vst.msk [vmem:[#allocation5] sm:$0xff] %vm405_vm13, %v402_v34 }
 0x1e3   :  { %417 = dma.vmem_to_hbm [thread:$0]  %s413_s19, 128, %s415_s22, [#allocation4]  }
 0x1e7   :  { %v403_v35 = vpop.f32.mrf.mxu0 }
 0x1e8   :  { %637 = dma.done.wait [#allocation4], 128  }
 0x1e9   :  { %638 = vsyncadd [#allocation4], 4294967168 }
 0x1ea   :  { %422 = vsyncpa [#allocation3], 1 }
 0x1eb   :  { %423 = vsyncpa [#allocation4], 1 }

</bundles_post_ra>
